<compile_context>
chip_gen: v7x
topology: tpu7x:2x2x1
jax: 0.10.0
libtpu: 0.0.40
codegen_flags: <defaults>
</compile_context>

<pallas_src>
import functools
import math

import jax
import jax.numpy as jnp
import numpy as np
from jax import lax
from jax.experimental import pallas as pl
from jax.experimental.pallas import tpu as pltpu

NUM_CLASSES = 3
LAMBDA_OBJ = 5.0
LAMBDA_CLS = 1.0
LAMBDA_BOX = 1.0
LAMBDA_L1 = 0.05
L_NOOBJ = 2.0
EPS = 1e-7

LANE = 128
SUB = 8
NUM_ACC = 6          # [bce_obj(all), bce_obj(pos), cnt_pos, bce_cls(pos), ciou(pos), l1(pos)]
NUM_SPLITS = 2       # leading 'parallel' grid axis -> both TCs on v7x, harmless elsewhere
MAX_TILE_R = 512     # 8ch * 512 * 128 * 4B = 2 MiB / input block; 8 MiB total double-buffered
OBJ_PAD = -1e4       # padded objectness logit: BCE(OBJ_PAD, 0) == 0.0 exactly (exp underflows)


# ---------------------------------------------------------------------------
# elementwise helpers (operate on (8, 128) f32 strips inside the kernel)
# ---------------------------------------------------------------------------
def _bce_with_logits(x, t):
    # max(x,0) - x*t + log(1 + exp(-|x|))  (matches nn.BCEWithLogitsLoss per-elem)
    return jnp.maximum(x, 0.0) - x * t + jnp.log(1.0 + jnp.exp(-jnp.abs(x)))


def _atan(x):
    # Cephes single-precision atanf, range-reduced odd polynomial.
    # TODO(synk): replace with jnp.arctan if Mosaic guarantees atan lowering.
    sign = jnp.where(x < 0.0, -1.0, 1.0)
    a = jnp.abs(x)
    tan3pio8 = 2.414213562373095
    tanpio8 = 0.4142135623730950
    big = a > tan3pio8
    mid = jnp.logical_and(a > tanpio8, jnp.logical_not(big))
    num = jnp.where(big, -1.0, jnp.where(mid, a - 1.0, a))
    den = jnp.where(big, a, jnp.where(mid, a + 1.0, 1.0))
    xr = num / den
    y0 = jnp.where(big, jnp.float32(math.pi / 2.0),
                   jnp.where(mid, jnp.float32(math.pi / 4.0), jnp.float32(0.0)))
    z = xr * xr
    poly = ((((8.05374449538e-2 * z - 1.38776856032e-1) * z
              + 1.99777106478e-1) * z - 3.33329491539e-1) * z * xr + xr)
    return sign * (y0 + poly)


def _atan_diff(tw, th_, pw, ph_):
    # atan(tw/th_) - atan(pw/ph_) via the single-atan identity (one poly, one
    # divide).  With a = tw/th_, b = pw/ph_:
    #   atan(a) - atan(b) = atan((a-b)/(1+ab)) + pi*sign(a)  if 1+ab < 0
    #                     = atan((a-b)/(1+ab))               otherwise
    # sign(1+ab) = sign(den)*sign(th_*ph_), which handles ph_ < 0 correctly.
    s = th_ * ph_
    num = tw * ph_ - pw * th_
    den = s + tw * pw                       # = th_*ph_*(1 + a*b)
    d0 = _atan(num / den)
    wrap = (den * s) < 0.0                  # 1 + a*b < 0
    corr = jnp.where(wrap,
                     jnp.where(tw * th_ > 0.0, jnp.float32(math.pi),
                               jnp.float32(-math.pi)),
                     0.0)
    return d0 + corr


def _ciou(px, py, pw, ph, tx, ty, tw, th):
    hpw, hph, htw, hth = pw * 0.5, ph * 0.5, tw * 0.5, th * 0.5
    px1, py1, px2, py2 = px - hpw, py - hph, px + hpw, py + hph
    tx1, ty1, tx2, ty2 = tx - htw, ty - hth, tx + htw, ty + hth
    iw = jnp.maximum(jnp.minimum(px2, tx2) - jnp.maximum(px1, tx1), 0.0)
    ih = jnp.maximum(jnp.minimum(py2, ty2) - jnp.maximum(py1, ty1), 0.0)
    inter = iw * ih
    union = (px2 - px1) * (py2 - py1) + (tx2 - tx1) * (ty2 - ty1) - inter
    iou = inter / (union + EPS)
    dx, dy = px - tx, py - ty
    cdist = dx * dx + dy * dy
    ew = jnp.maximum(px2, tx2) - jnp.minimum(px1, tx1)
    eh = jnp.maximum(py2, ty2) - jnp.minimum(py1, ty1)
    ediag = ew * ew + eh * eh
    dat = _atan_diff(tw, th + EPS, pw, ph + EPS)
    v = (4.0 / (math.pi ** 2)) * dat * dat
    alpha = v / (1.0 - iou + v + EPS)
    return iou - cdist / (ediag + EPS) - alpha * v


# ---------------------------------------------------------------------------
# Pallas kernel: streams (F, tile_r, 128) channel-major tiles, walks them in
# (8, 128) strips and accumulates 6 partial sums.
# ---------------------------------------------------------------------------
def _yolo_loss_kernel(p_ref, t_ref, o_ref, acc_ref, *, tile_r, num_classes):
    i = pl.program_id(1)          # tile within split (reduction axis)
    steps = pl.num_programs(1)

    @pl.when(i == 0)
    def _init():
        acc_ref[...] = jnp.zeros_like(acc_ref)

    f32 = jnp.float32
    n_strips = tile_r // SUB

    def strip_body(s, carry):
        a_all, a_obj, a_cnt, a_cls, a_iou, a_l1 = carry
        r0 = pl.multiple_of(s * SUB, SUB)

        def ld(ref, ch):
            return ref[ch, pl.ds(r0, SUB), :].astype(f32)

        px, py = ld(p_ref, 0), ld(p_ref, 1)
        pw, ph = ld(p_ref, 2), ld(p_ref, 3)
        tx, ty = ld(t_ref, 0), ld(t_ref, 1)
        tw, th = ld(t_ref, 2), ld(t_ref, 3)
        p_obj, t_obj = ld(p_ref, 4), ld(t_ref, 4)
        pos = t_obj > 0.0

        bce_obj = _bce_with_logits(p_obj, t_obj)
        # padded anchors contribute exactly 0 here (OBJ_PAD trick) -> no valid mask
        a_all = a_all + bce_obj
        a_obj = a_obj + jnp.where(pos, bce_obj, 0.0)
        a_cnt = a_cnt + jnp.where(pos, 1.0, 0.0)

        cls_bce = jnp.zeros((SUB, LANE), f32)
        for k in range(num_classes):
            cls_bce = cls_bce + _bce_with_logits(ld(p_ref, 5 + k), ld(t_ref, 5 + k))
        a_cls = a_cls + jnp.where(pos, cls_bce, 0.0)

        ciou = _ciou(px, py, pw, ph, tx, ty, tw, th)
        # where-select (not multiply-mask): NaN/Inf on non-positive rows cannot leak
        a_iou = a_iou + jnp.where(pos, ciou, 0.0)

        l1 = (jnp.abs(px - tx) + jnp.abs(py - ty)
              + jnp.abs(pw - tw) + jnp.abs(ph - th))
        a_l1 = a_l1 + jnp.where(pos, l1, 0.0)
        return (a_all, a_obj, a_cnt, a_cls, a_iou, a_l1)

    init = tuple(jnp.zeros((SUB, LANE), f32) for _ in range(NUM_ACC))
    sums = lax.fori_loop(0, n_strips, strip_body, init)

    for k in range(NUM_ACC):
        acc_ref[k] = acc_ref[k] + sums[k]

    @pl.when(i == steps - 1)
    def _finalize():
        o_ref[...] = acc_ref[...].reshape((1, NUM_ACC, SUB, LANE))


def yolov8_loss(preds, targets, num_classes=NUM_CLASSES):
    """preds/targets: (B, G, 5 + num_classes) -> scalar loss (f32)."""
    B, G, Fdim = preds.shape
    assert Fdim == 5 + num_classes
    n = B * G

    # bf16 inputs are streamed as bf16 (half the HBM traffic) and upcast in-kernel.
    compute_dtype = jnp.bfloat16 if preds.dtype == jnp.bfloat16 else jnp.float32

    r_need = max(1, -(-n // LANE))
    per_split = -(-r_need // NUM_SPLITS)
    tile_r = min(MAX_TILE_R, ((per_split + SUB - 1) // SUB) * SUB)
    chunk = NUM_SPLITS * tile_r
    r_total = ((r_need + chunk - 1) // chunk) * chunk
    steps = r_total // chunk
    n_pad = r_total * LANE

    # Channel-major, lane/sublane-dense layout: (F, r_total, 128).
    # TODO(synk): emit this layout upstream to avoid the transpose/pad HBM pass.
    def repack(x, obj_pad=None):
        x = jnp.transpose(x.reshape(n, Fdim).astype(compute_dtype))  # (F, n)
        x = jnp.pad(x, ((0, 0), (0, n_pad - n)))
        if obj_pad is not None and n_pad > n:
            # padded objectness logits -> BCE(obj_pad, 0) == 0 exactly
            x = x.at[4, n:].set(jnp.asarray(obj_pad, compute_dtype))
        return x.reshape(Fdim, r_total, LANE)

    p = repack(preds, obj_pad=OBJ_PAD)
    t = repack(targets)

    idx_in = lambda c, i: (0, c * steps + i, 0)
    kernel = functools.partial(_yolo_loss_kernel, tile_r=tile_r,
                               num_classes=num_classes)

    elem_bytes = jnp.dtype(compute_dtype).itemsize
    cost = pl.CostEstimate(
        flops=140 * n_pad,
        transcendentals=9 * n_pad,
        bytes_accessed=2 * Fdim * n_pad * elem_bytes
                       + NUM_SPLITS * NUM_ACC * SUB * LANE * 4)

    partial_sums = pl.pallas_call(
        kernel,
        out_shape=jax.ShapeDtypeStruct((NUM_SPLITS, NUM_ACC, SUB, LANE),
                                       jnp.float32),
        grid_spec=pltpu.PrefetchScalarGridSpec(
            num_scalar_prefetch=0,
            grid=(NUM_SPLITS, steps),
            in_specs=[pl.BlockSpec((Fdim, tile_r, LANE), idx_in),
                      pl.BlockSpec((Fdim, tile_r, LANE), idx_in)],
            out_specs=pl.BlockSpec((1, NUM_ACC, SUB, LANE),
                                   lambda c, i: (c, 0, 0, 0)),
            scratch_shapes=[pltpu.VMEM((NUM_ACC, SUB, LANE), jnp.float32)]),
        # "parallel" is safe on 1-TC chips; on v7x verify it shards across the
        # two TensorCores (switch to pltpu.CORE_PARALLEL there if it does not).
        compiler_params=pltpu.CompilerParams(
            dimension_semantics=("parallel", "arbitrary"),
            allow_input_fusion=[True, True]),
        cost_estimate=cost,
    )(p, t)

    # Final combine on 6 scalars (negligible; also merges the per-split partials).
    s = jnp.sum(partial_sums, axis=(0, 2, 3))   # (NUM_ACC,)
    sum_obj_all, sum_obj_pos, cnt_pos = s[0], s[1], s[2]
    sum_cls, sum_ciou, sum_l1 = s[3], s[4], s[5]

    nf = jnp.float32(n)
    cnt_neg = nf - cnt_pos
    sum_obj_neg = sum_obj_all - sum_obj_pos
    safe_pos = jnp.maximum(cnt_pos, 1.0)
    # NaN guard for the (unrealistic) all-positive case; torch's empty mean
    # would produce NaN here.  Documented divergence.
    safe_neg = jnp.maximum(cnt_neg, 1.0)

    loss_noobj = sum_obj_neg / safe_neg
    loss_obj = sum_obj_pos / safe_pos
    loss_cls = sum_cls / (safe_pos * jnp.float32(num_classes))
    mean_ciou = sum_ciou / safe_pos
    l1_mean = sum_l1 / (safe_pos * 4.0)
    loss_box = (1.0 - mean_ciou) + LAMBDA_L1 * l1_mean

    total = jnp.where(
        cnt_pos > 0.0,
        (LAMBDA_OBJ * loss_obj + L_NOOBJ * loss_noobj
         + LAMBDA_CLS * loss_cls + LAMBDA_BOX * loss_box),
        L_NOOBJ * loss_noobj)
    return total


# ---------------------------------------------------------------------------
# Pure-JAX reference (mirrors the PyTorch module) for correctness checking
# ---------------------------------------------------------------------------
def yolov8_loss_ref(preds, targets):
    preds = preds.astype(jnp.float32)
    targets = targets.astype(jnp.float32)
    pb, po, pc = preds[..., :4], preds[..., 4], preds[..., 5:]
    tb, to, tc = targets[..., :4], targets[..., 4], targets[..., 5:]
    pos = to > 0

    def bce(x, y):
        return jnp.mean(jnp.maximum(x, 0.0) - x * y + jnp.log1p(jnp.exp(-jnp.abs(x))))

    def ciou(p4, t4):
        px, py, pw, ph = p4[..., 0], p4[..., 1], p4[..., 2], p4[..., 3]
        tx, ty, tw, th = t4[..., 0], t4[..., 1], t4[..., 2], t4[..., 3]
        px1, py1, px2, py2 = px - pw / 2, py - ph / 2, px + pw / 2, py + ph / 2
        tx1, ty1, tx2, ty2 = tx - tw / 2, ty - th / 2, tx + tw / 2, ty + th / 2
        inter = (jnp.clip(jnp.minimum(px2, tx2) - jnp.maximum(px1, tx1), 0)
                 * jnp.clip(jnp.minimum(py2, ty2) - jnp.maximum(py1, ty1), 0))
        union = (px2 - px1) * (py2 - py1) + (tx2 - tx1) * (ty2 - ty1) - inter
        iou = inter / (union + EPS)
        cdist = (px - tx) ** 2 + (py - ty) ** 2
        ediag = ((jnp.maximum(px2, tx2) - jnp.minimum(px1, tx1)) ** 2
                 + (jnp.maximum(py2, ty2) - jnp.minimum(py1, ty1)) ** 2)
        v = 4 / math.pi ** 2 * (jnp.arctan(tw / (th + EPS)) - jnp.arctan(pw / (ph + EPS))) ** 2
        alpha = v / (1 - iou + v + EPS)
        return iou - cdist / (ediag + EPS) - alpha * v

    loss_noobj = bce(po[~pos], to[~pos])
    if int(jnp.sum(pos)) != 0:
        loss_obj = bce(po[pos], to[pos])
        loss_cls = bce(pc[pos], tc[pos])
        iou_loss = 1.0 - ciou(pb[pos], tb[pos])
        l1 = jnp.mean(jnp.abs(pb[pos] - tb[pos]))
        loss_box = iou_loss + LAMBDA_L1 * l1
        return (LAMBDA_OBJ * loss_obj + L_NOOBJ * loss_noobj
                + LAMBDA_CLS * loss_cls + LAMBDA_BOX * jnp.mean(loss_box))
    return L_NOOBJ * loss_noobj


if __name__ == "__main__":
    key = jax.random.PRNGKey(0)

    def make_inputs(k, B, G, C):
        Fd = 5 + C
        k1, k2, k3, k4 = jax.random.split(k, 4)
        preds = jax.random.normal(k1, (B, G, Fd), jnp.float32)
        t_bbox = jax.random.uniform(k2, (B, G, 4), jnp.float32, 0.1, 1.0)
        t_obj = (jax.random.uniform(k3, (B, G, 1)) > 0.6).astype(jnp.float32)
        t_cls = (jax.random.uniform(k4, (B, G, C)) > 0.5).astype(jnp.float32)
        targets = jnp.concatenate([t_bbox, t_obj, t_cls], axis=-1)
        # ensure both positive and negative anchors exist
        targets = targets.at[0, 0, 4].set(1.0).at[0, 1, 4].set(0.0)
        return preds, targets

    loss_fn = jax.jit(yolov8_loss)
    ka, kb = jax.random.split(key)

    # small shape (single tile per split, heavy padding -> exercises OBJ_PAD path)
    preds, targets = make_inputs(ka, 2, 8, NUM_CLASSES)
    out = jax.block_until_ready(loss_fn(preds, targets))
    ref = yolov8_loss_ref(preds, targets)
    assert np.allclose(np.asarray(out), np.asarray(ref), rtol=1e-4, atol=1e-4), (out, ref)

    # larger shape: exercises multi-strip accumulation, both grid splits and a
    # ragged tail (looser tolerance: f32 reduction order differs from the
    # reference's mean)
    preds2, targets2 = make_inputs(kb, 2, 20000, NUM_CLASSES)
    out2 = jax.block_until_ready(loss_fn(preds2, targets2))
    ref2 = yolov8_loss_ref(preds2, targets2)
    assert np.allclose(np.asarray(out2), np.asarray(ref2), rtol=1e-3, atol=1e-3), (out2, ref2)

    print("KERNEL_OK")
</pallas_src>

<mosaic_0001>
module attributes {stable_mosaic.version = 11 : i64} {
  func.func @_yolo_loss_kernel(%arg0: i32, %arg1: i32, %arg2: memref<8x8x128xf32, #tpu.memory_space<vmem>>, %arg3: memref<8x8x128xf32, #tpu.memory_space<vmem>>, %arg4: memref<1x6x8x128xf32, #tpu.memory_space<vmem>>, %arg5: memref<6x8x128xf32, #tpu.memory_space<vmem>>) attributes {dimension_semantics = [#tpu.dimension_semantics<parallel>, #tpu.dimension_semantics<arbitrary>], iteration_bounds = array<i64: 2, 1>, scalar_prefetch = 0 : i64, scratch_operands = 1 : i64, tpu.core_type = #tpu.core_type<tc>, window_params = [{transform_indices = @transform_0, window_bounds = array<i64: 8, 8, 128>}, {transform_indices = @transform_1, window_bounds = array<i64: 8, 8, 128>}, {transform_indices = @transform_2, window_bounds = array<i64: 1, 6, 8, 128>}]} {
    %c0_i32 = arith.constant 0 : i32
    %0 = arith.cmpi eq, %arg1, %c0_i32 : i32
    %1 = arith.extui %0 : i1 to i32
    %c0_i32_0 = arith.constant 0 : i32
    %2 = arith.cmpi ne, %1, %c0_i32_0 : i32
    scf.if %2 {
      %cst_124 = arith.constant 0.000000e+00 : f32
      %314 = vector.broadcast %cst_124 : f32 to vector<6x8x128xf32>
      %c0_125 = arith.constant 0 : index
      %c0_126 = arith.constant 0 : index
      %c0_127 = arith.constant 0 : index
      %315 = vector.load %arg5[%c0_125, %c0_126, %c0_127] : memref<6x8x128xf32, #tpu.memory_space<vmem>>, vector<6x8x128xf32>
      tpu.vector_store %arg5[%c0_125, %c0_126, %c0_127], %314 {strides = array<i32>} : memref<6x8x128xf32, #tpu.memory_space<vmem>>, vector<6x8x128xf32>,
    } else {
    }
    %cst = arith.constant 0.000000e+00 : f32
    %3 = vector.broadcast %cst : f32 to vector<8x128xf32>
    %cst_1 = arith.constant 0.000000e+00 : f32
    %4 = vector.broadcast %cst_1 : f32 to vector<8x128xf32>
    %cst_2 = arith.constant 0.000000e+00 : f32
    %5 = vector.broadcast %cst_2 : f32 to vector<8x128xf32>
    %cst_3 = arith.constant 0.000000e+00 : f32
    %6 = vector.broadcast %cst_3 : f32 to vector<8x128xf32>
    %cst_4 = arith.constant 0.000000e+00 : f32
    %7 = vector.broadcast %cst_4 : f32 to vector<8x128xf32>
    %cst_5 = arith.constant 0.000000e+00 : f32
    %8 = vector.broadcast %cst_5 : f32 to vector<8x128xf32>
    %c0_i32_6 = arith.constant 0 : i32
    %c8_i32 = arith.constant 8 : i32
    %9 = arith.muli %c0_i32_6, %c8_i32 : i32
    %10 = tpu.assume_multiple %9, 8 : i32
    %c0 = arith.constant 0 : index
    %11 = arith.index_cast %10 : i32 to index
    %c0_7 = arith.constant 0 : index
    %12 = vector.load %arg2[%c0, %11, %c0_7] : memref<8x8x128xf32, #tpu.memory_space<vmem>>, vector<1x8x128xf32>
    %13 = vector.shape_cast %12 : vector<1x8x128xf32> to vector<8x128xf32>
    %c1 = arith.constant 1 : index
    %14 = arith.index_cast %10 : i32 to index
    %c0_8 = arith.constant 0 : index
    %15 = vector.load %arg2[%c1, %14, %c0_8] : memref<8x8x128xf32, #tpu.memory_space<vmem>>, vector<1x8x128xf32>
    %16 = vector.shape_cast %15 : vector<1x8x128xf32> to vector<8x128xf32>
    %c2 = arith.constant 2 : index
    %17 = arith.index_cast %10 : i32 to index
    %c0_9 = arith.constant 0 : index
    %18 = vector.load %arg2[%c2, %17, %c0_9] : memref<8x8x128xf32, #tpu.memory_space<vmem>>, vector<1x8x128xf32>
    %19 = vector.shape_cast %18 : vector<1x8x128xf32> to vector<8x128xf32>
    %c3 = arith.constant 3 : index
    %20 = arith.index_cast %10 : i32 to index
    %c0_10 = arith.constant 0 : index
    %21 = vector.load %arg2[%c3, %20, %c0_10] : memref<8x8x128xf32, #tpu.memory_space<vmem>>, vector<1x8x128xf32>
    %22 = vector.shape_cast %21 : vector<1x8x128xf32> to vector<8x128xf32>
    %c0_11 = arith.constant 0 : index
    %23 = arith.index_cast %10 : i32 to index
    %c0_12 = arith.constant 0 : index
    %24 = vector.load %arg3[%c0_11, %23, %c0_12] : memref<8x8x128xf32, #tpu.memory_space<vmem>>, vector<1x8x128xf32>
    %25 = vector.shape_cast %24 : vector<1x8x128xf32> to vector<8x128xf32>
    %c1_13 = arith.constant 1 : index
    %26 = arith.index_cast %10 : i32 to index
    %c0_14 = arith.constant 0 : index
    %27 = vector.load %arg3[%c1_13, %26, %c0_14] : memref<8x8x128xf32, #tpu.memory_space<vmem>>, vector<1x8x128xf32>
    %28 = vector.shape_cast %27 : vector<1x8x128xf32> to vector<8x128xf32>
    %c2_15 = arith.constant 2 : index
    %29 = arith.index_cast %10 : i32 to index
    %c0_16 = arith.constant 0 : index
    %30 = vector.load %arg3[%c2_15, %29, %c0_16] : memref<8x8x128xf32, #tpu.memory_space<vmem>>, vector<1x8x128xf32>
    %31 = vector.shape_cast %30 : vector<1x8x128xf32> to vector<8x128xf32>
    %c3_17 = arith.constant 3 : index
    %32 = arith.index_cast %10 : i32 to index
    %c0_18 = arith.constant 0 : index
    %33 = vector.load %arg3[%c3_17, %32, %c0_18] : memref<8x8x128xf32, #tpu.memory_space<vmem>>, vector<1x8x128xf32>
    %34 = vector.shape_cast %33 : vector<1x8x128xf32> to vector<8x128xf32>
    %c4 = arith.constant 4 : index
    %35 = arith.index_cast %10 : i32 to index
    %c0_19 = arith.constant 0 : index
    %36 = vector.load %arg2[%c4, %35, %c0_19] : memref<8x8x128xf32, #tpu.memory_space<vmem>>, vector<1x8x128xf32>
    %37 = vector.shape_cast %36 : vector<1x8x128xf32> to vector<8x128xf32>
    %c4_20 = arith.constant 4 : index
    %38 = arith.index_cast %10 : i32 to index
    %c0_21 = arith.constant 0 : index
    %39 = vector.load %arg3[%c4_20, %38, %c0_21] : memref<8x8x128xf32, #tpu.memory_space<vmem>>, vector<1x8x128xf32>
    %40 = vector.shape_cast %39 : vector<1x8x128xf32> to vector<8x128xf32>
    %cst_22 = arith.constant 0.000000e+00 : f32
    %41 = vector.broadcast %cst_22 : f32 to vector<8x128xf32>
    %42 = arith.cmpf ogt, %40, %41 : vector<8x128xf32>
    %cst_23 = arith.constant 0.000000e+00 : f32
    %43 = vector.broadcast %cst_23 : f32 to vector<8x128xf32>
    %44 = arith.maximumf %37, %43 : vector<8x128xf32>
    %45 = arith.mulf %37, %40 : vector<8x128xf32>
    %46 = arith.subf %44, %45 : vector<8x128xf32>
    %47 = math.absf %37 : vector<8x128xf32>
    %cst_24 = arith.constant 0.000000e+00 : f32
    %48 = vector.broadcast %cst_24 : f32 to vector<8x128xf32>
    %49 = arith.subf %48, %47 : vector<8x128xf32>
    %50 = math.exp %49 : vector<8x128xf32>
    %cst_25 = arith.constant 1.000000e+00 : f32
    %51 = vector.broadcast %cst_25 : f32 to vector<8x128xf32>
    %52 = arith.addf %51, %50 : vector<8x128xf32>
    %53 = math.log %52 : vector<8x128xf32>
    %54 = arith.addf %46, %53 : vector<8x128xf32>
    %55 = arith.addf %3, %54 : vector<8x128xf32>
    %cst_26 = arith.constant 0.000000e+00 : f32
    %56 = vector.broadcast %cst_26 : f32 to vector<8x128xf32>
    %57 = arith.select %42, %54, %56 : vector<8x128xi1>, vector<8x128xf32>
    %58 = arith.addf %4, %57 : vector<8x128xf32>
    %cst_27 = arith.constant 1.000000e+00 : f32
    %cst_28 = arith.constant 0.000000e+00 : f32
    %59 = vector.broadcast %cst_27 : f32 to vector<8x128xf32>
    %60 = vector.broadcast %cst_28 : f32 to vector<8x128xf32>
    %61 = arith.select %42, %59, %60 : vector<8x128xi1>, vector<8x128xf32>
    %62 = arith.addf %5, %61 : vector<8x128xf32>
    %cst_29 = arith.constant 0.000000e+00 : f32
    %63 = vector.broadcast %cst_29 : f32 to vector<8x128xf32>
    %c5 = arith.constant 5 : index
    %64 = arith.index_cast %10 : i32 to index
    %c0_30 = arith.constant 0 : index
    %65 = vector.load %arg2[%c5, %64, %c0_30] : memref<8x8x128xf32, #tpu.memory_space<vmem>>, vector<1x8x128xf32>
    %66 = vector.shape_cast %65 : vector<1x8x128xf32> to vector<8x128xf32>
    %c5_31 = arith.constant 5 : index
    %67 = arith.index_cast %10 : i32 to index
    %c0_32 = arith.constant 0 : index
    %68 = vector.load %arg3[%c5_31, %67, %c0_32] : memref<8x8x128xf32, #tpu.memory_space<vmem>>, vector<1x8x128xf32>
    %69 = vector.shape_cast %68 : vector<1x8x128xf32> to vector<8x128xf32>
    %cst_33 = arith.constant 0.000000e+00 : f32
    %70 = vector.broadcast %cst_33 : f32 to vector<8x128xf32>
    %71 = arith.maximumf %66, %70 : vector<8x128xf32>
    %72 = arith.mulf %66, %69 : vector<8x128xf32>
    %73 = arith.subf %71, %72 : vector<8x128xf32>
    %74 = math.absf %66 : vector<8x128xf32>
    %cst_34 = arith.constant 0.000000e+00 : f32
    %75 = vector.broadcast %cst_34 : f32 to vector<8x128xf32>
    %76 = arith.subf %75, %74 : vector<8x128xf32>
    %77 = math.exp %76 : vector<8x128xf32>
    %cst_35 = arith.constant 1.000000e+00 : f32
    %78 = vector.broadcast %cst_35 : f32 to vector<8x128xf32>
    %79 = arith.addf %78, %77 : vector<8x128xf32>
    %80 = math.log %79 : vector<8x128xf32>
    %81 = arith.addf %73, %80 : vector<8x128xf32>
    %82 = arith.addf %63, %81 : vector<8x128xf32>
    %c6 = arith.constant 6 : index
    %83 = arith.index_cast %10 : i32 to index
    %c0_36 = arith.constant 0 : index
    %84 = vector.load %arg2[%c6, %83, %c0_36] : memref<8x8x128xf32, #tpu.memory_space<vmem>>, vector<1x8x128xf32>
    %85 = vector.shape_cast %84 : vector<1x8x128xf32> to vector<8x128xf32>
    %c6_37 = arith.constant 6 : index
    %86 = arith.index_cast %10 : i32 to index
    %c0_38 = arith.constant 0 : index
    %87 = vector.load %arg3[%c6_37, %86, %c0_38] : memref<8x8x128xf32, #tpu.memory_space<vmem>>, vector<1x8x128xf32>
    %88 = vector.shape_cast %87 : vector<1x8x128xf32> to vector<8x128xf32>
    %cst_39 = arith.constant 0.000000e+00 : f32
    %89 = vector.broadcast %cst_39 : f32 to vector<8x128xf32>
    %90 = arith.maximumf %85, %89 : vector<8x128xf32>
    %91 = arith.mulf %85, %88 : vector<8x128xf32>
    %92 = arith.subf %90, %91 : vector<8x128xf32>
    %93 = math.absf %85 : vector<8x128xf32>
    %cst_40 = arith.constant 0.000000e+00 : f32
    %94 = vector.broadcast %cst_40 : f32 to vector<8x128xf32>
    %95 = arith.subf %94, %93 : vector<8x128xf32>
    %96 = math.exp %95 : vector<8x128xf32>
    %cst_41 = arith.constant 1.000000e+00 : f32
    %97 = vector.broadcast %cst_41 : f32 to vector<8x128xf32>
    %98 = arith.addf %97, %96 : vector<8x128xf32>
    %99 = math.log %98 : vector<8x128xf32>
    %100 = arith.addf %92, %99 : vector<8x128xf32>
    %101 = arith.addf %82, %100 : vector<8x128xf32>
    %c7 = arith.constant 7 : index
    %102 = arith.index_cast %10 : i32 to index
    %c0_42 = arith.constant 0 : index
    %103 = vector.load %arg2[%c7, %102, %c0_42] : memref<8x8x128xf32, #tpu.memory_space<vmem>>, vector<1x8x128xf32>
    %104 = vector.shape_cast %103 : vector<1x8x128xf32> to vector<8x128xf32>
    %c7_43 = arith.constant 7 : index
    %105 = arith.index_cast %10 : i32 to index
    %c0_44 = arith.constant 0 : index
    %106 = vector.load %arg3[%c7_43, %105, %c0_44] : memref<8x8x128xf32, #tpu.memory_space<vmem>>, vector<1x8x128xf32>
    %107 = vector.shape_cast %106 : vector<1x8x128xf32> to vector<8x128xf32>
    %cst_45 = arith.constant 0.000000e+00 : f32
    %108 = vector.broadcast %cst_45 : f32 to vector<8x128xf32>
    %109 = arith.maximumf %104, %108 : vector<8x128xf32>
    %110 = arith.mulf %104, %107 : vector<8x128xf32>
    %111 = arith.subf %109, %110 : vector<8x128xf32>
    %112 = math.absf %104 : vector<8x128xf32>
    %cst_46 = arith.constant 0.000000e+00 : f32
    %113 = vector.broadcast %cst_46 : f32 to vector<8x128xf32>
    %114 = arith.subf %113, %112 : vector<8x128xf32>
    %115 = math.exp %114 : vector<8x128xf32>
    %cst_47 = arith.constant 1.000000e+00 : f32
    %116 = vector.broadcast %cst_47 : f32 to vector<8x128xf32>
    %117 = arith.addf %116, %115 : vector<8x128xf32>
    %118 = math.log %117 : vector<8x128xf32>
    %119 = arith.addf %111, %118 : vector<8x128xf32>
    %120 = arith.addf %101, %119 : vector<8x128xf32>
    %cst_48 = arith.constant 0.000000e+00 : f32
    %121 = vector.broadcast %cst_48 : f32 to vector<8x128xf32>
    %122 = arith.select %42, %120, %121 : vector<8x128xi1>, vector<8x128xf32>
    %123 = arith.addf %6, %122 : vector<8x128xf32>
    %cst_49 = arith.constant 5.000000e-01 : f32
    %124 = vector.broadcast %cst_49 : f32 to vector<8x128xf32>
    %125 = arith.mulf %19, %124 : vector<8x128xf32>
    %cst_50 = arith.constant 5.000000e-01 : f32
    %126 = vector.broadcast %cst_50 : f32 to vector<8x128xf32>
    %127 = arith.mulf %22, %126 : vector<8x128xf32>
    %cst_51 = arith.constant 5.000000e-01 : f32
    %128 = vector.broadcast %cst_51 : f32 to vector<8x128xf32>
    %129 = arith.mulf %31, %128 : vector<8x128xf32>
    %cst_52 = arith.constant 5.000000e-01 : f32
    %130 = vector.broadcast %cst_52 : f32 to vector<8x128xf32>
    %131 = arith.mulf %34, %130 : vector<8x128xf32>
    %132 = arith.subf %13, %125 : vector<8x128xf32>
    %133 = arith.subf %16, %127 : vector<8x128xf32>
    %134 = arith.addf %13, %125 : vector<8x128xf32>
    %135 = arith.addf %16, %127 : vector<8x128xf32>
    %136 = arith.subf %25, %129 : vector<8x128xf32>
    %137 = arith.subf %28, %131 : vector<8x128xf32>
    %138 = arith.addf %25, %129 : vector<8x128xf32>
    %139 = arith.addf %28, %131 : vector<8x128xf32>
    %140 = arith.minimumf %134, %138 : vector<8x128xf32>
    %141 = arith.maximumf %132, %136 : vector<8x128xf32>
    %142 = arith.subf %140, %141 : vector<8x128xf32>
    %cst_53 = arith.constant 0.000000e+00 : f32
    %143 = vector.broadcast %cst_53 : f32 to vector<8x128xf32>
    %144 = arith.maximumf %142, %143 : vector<8x128xf32>
    %145 = arith.minimumf %135, %139 : vector<8x128xf32>
    %146 = arith.maximumf %133, %137 : vector<8x128xf32>
    %147 = arith.subf %145, %146 : vector<8x128xf32>
    %cst_54 = arith.constant 0.000000e+00 : f32
    %148 = vector.broadcast %cst_54 : f32 to vector<8x128xf32>
    %149 = arith.maximumf %147, %148 : vector<8x128xf32>
    %150 = arith.mulf %144, %149 : vector<8x128xf32>
    %151 = arith.subf %134, %132 : vector<8x128xf32>
    %152 = arith.subf %135, %133 : vector<8x128xf32>
    %153 = arith.mulf %151, %152 : vector<8x128xf32>
    %154 = arith.subf %138, %136 : vector<8x128xf32>
    %155 = arith.subf %139, %137 : vector<8x128xf32>
    %156 = arith.mulf %154, %155 : vector<8x128xf32>
    %157 = arith.addf %153, %156 : vector<8x128xf32>
    %158 = arith.subf %157, %150 : vector<8x128xf32>
    %cst_55 = arith.constant 1.000000e-07 : f32
    %159 = vector.broadcast %cst_55 : f32 to vector<8x128xf32>
    %160 = arith.addf %158, %159 : vector<8x128xf32>
    %161 = arith.divf %150, %160 : vector<8x128xf32>
    %162 = arith.subf %13, %25 : vector<8x128xf32>
    %163 = arith.subf %16, %28 : vector<8x128xf32>
    %164 = arith.mulf %162, %162 : vector<8x128xf32>
    %165 = arith.mulf %163, %163 : vector<8x128xf32>
    %166 = arith.addf %164, %165 : vector<8x128xf32>
    %167 = arith.maximumf %134, %138 : vector<8x128xf32>
    %168 = arith.minimumf %132, %136 : vector<8x128xf32>
    %169 = arith.subf %167, %168 : vector<8x128xf32>
    %170 = arith.maximumf %135, %139 : vector<8x128xf32>
    %171 = arith.minimumf %133, %137 : vector<8x128xf32>
    %172 = arith.subf %170, %171 : vector<8x128xf32>
    %173 = arith.mulf %169, %169 : vector<8x128xf32>
    %174 = arith.mulf %172, %172 : vector<8x128xf32>
    %175 = arith.addf %173, %174 : vector<8x128xf32>
    %cst_56 = arith.constant 1.000000e-07 : f32
    %176 = vector.broadcast %cst_56 : f32 to vector<8x128xf32>
    %177 = arith.addf %34, %176 : vector<8x128xf32>
    %cst_57 = arith.constant 1.000000e-07 : f32
    %178 = vector.broadcast %cst_57 : f32 to vector<8x128xf32>
    %179 = arith.addf %22, %178 : vector<8x128xf32>
    %180 = arith.mulf %177, %179 : vector<8x128xf32>
    %181 = arith.mulf %31, %179 : vector<8x128xf32>
    %182 = arith.mulf %19, %177 : vector<8x128xf32>
    %183 = arith.subf %181, %182 : vector<8x128xf32>
    %184 = arith.mulf %31, %19 : vector<8x128xf32>
    %185 = arith.addf %180, %184 : vector<8x128xf32>
    %186 = arith.divf %183, %185 : vector<8x128xf32>
    %cst_58 = arith.constant 0.000000e+00 : f32
    %187 = vector.broadcast %cst_58 : f32 to vector<8x128xf32>
    %188 = arith.cmpf olt, %186, %187 : vector<8x128xf32>
    %cst_59 = arith.constant -1.000000e+00 : f32
    %cst_60 = arith.constant 1.000000e+00 : f32
    %189 = vector.broadcast %cst_59 : f32 to vector<8x128xf32>
    %190 = vector.broadcast %cst_60 : f32 to vector<8x128xf32>
    %191 = arith.select %188, %189, %190 : vector<8x128xi1>, vector<8x128xf32>
    %192 = math.absf %186 : vector<8x128xf32>
    %cst_61 = arith.constant 2.41421366 : f32
    %193 = vector.broadcast %cst_61 : f32 to vector<8x128xf32>
    %194 = arith.cmpf ogt, %192, %193 : vector<8x128xf32>
    %cst_62 = arith.constant 0.414213568 : f32
    %195 = vector.broadcast %cst_62 : f32 to vector<8x128xf32>
    %196 = arith.cmpf ogt, %192, %195 : vector<8x128xf32>
    %cst_63 = arith.constant dense<true> : vector<8x128xi1>
    %197 = arith.xori %194, %cst_63 : vector<8x128xi1>
    %198 = arith.andi %196, %197 : vector<8x128xi1>
    %cst_64 = arith.constant 1.000000e+00 : f32
    %199 = vector.broadcast %cst_64 : f32 to vector<8x128xf32>
    %200 = arith.subf %192, %199 : vector<8x128xf32>
    %201 = arith.select %198, %200, %192 : vector<8x128xi1>, vector<8x128xf32>
    %cst_65 = arith.constant -1.000000e+00 : f32
    %202 = vector.broadcast %cst_65 : f32 to vector<8x128xf32>
    %203 = arith.select %194, %202, %201 : vector<8x128xi1>, vector<8x128xf32>
    %cst_66 = arith.constant 1.000000e+00 : f32
    %204 = vector.broadcast %cst_66 : f32 to vector<8x128xf32>
    %205 = arith.addf %192, %204 : vector<8x128xf32>
    %cst_67 = arith.constant 1.000000e+00 : f32
    %206 = vector.broadcast %cst_67 : f32 to vector<8x128xf32>
    %207 = arith.select %198, %205, %206 : vector<8x128xi1>, vector<8x128xf32>
    %208 = arith.select %194, %192, %207 : vector<8x128xi1>, vector<8x128xf32>
    %209 = arith.divf %203, %208 : vector<8x128xf32>
    %cst_68 = arith.constant 0.785398185 : f32
    %cst_69 = arith.constant 0.000000e+00 : f32
    %210 = vector.broadcast %cst_68 : f32 to vector<8x128xf32>
    %211 = vector.broadcast %cst_69 : f32 to vector<8x128xf32>
    %212 = arith.select %198, %210, %211 : vector<8x128xi1>, vector<8x128xf32>
    %cst_70 = arith.constant 1.57079637 : f32
    %213 = vector.broadcast %cst_70 : f32 to vector<8x128xf32>
    %214 = arith.select %194, %213, %212 : vector<8x128xi1>, vector<8x128xf32>
    %215 = arith.mulf %209, %209 : vector<8x128xf32>
    %cst_71 = arith.constant 0.0805374458 : f32
    %216 = vector.broadcast %cst_71 : f32 to vector<8x128xf32>
    %217 = arith.mulf %216, %215 : vector<8x128xf32>
    %cst_72 = arith.constant 0.138776854 : f32
    %218 = vector.broadcast %cst_72 : f32 to vector<8x128xf32>
    %219 = arith.subf %217, %218 : vector<8x128xf32>
    %220 = arith.mulf %219, %215 : vector<8x128xf32>
    %cst_73 = arith.constant 0.199777111 : f32
    %221 = vector.broadcast %cst_73 : f32 to vector<8x128xf32>
    %222 = arith.addf %220, %221 : vector<8x128xf32>
    %223 = arith.mulf %222, %215 : vector<8x128xf32>
    %cst_74 = arith.constant 0.333329499 : f32
    %224 = vector.broadcast %cst_74 : f32 to vector<8x128xf32>
    %225 = arith.subf %223, %224 : vector<8x128xf32>
    %226 = arith.mulf %225, %215 : vector<8x128xf32>
    %227 = arith.mulf %226, %209 : vector<8x128xf32>
    %228 = arith.addf %227, %209 : vector<8x128xf32>
    %229 = arith.addf %214, %228 : vector<8x128xf32>
    %230 = arith.mulf %191, %229 : vector<8x128xf32>
    %231 = arith.mulf %185, %180 : vector<8x128xf32>
    %cst_75 = arith.constant 0.000000e+00 : f32
    %232 = vector.broadcast %cst_75 : f32 to vector<8x128xf32>
    %233 = arith.cmpf olt, %231, %232 : vector<8x128xf32>
    %234 = arith.mulf %31, %177 : vector<8x128xf32>
    %cst_76 = arith.constant 0.000000e+00 : f32
    %235 = vector.broadcast %cst_76 : f32 to vector<8x128xf32>
    %236 = arith.cmpf ogt, %234, %235 : vector<8x128xf32>
    %cst_77 = arith.constant 3.14159274 : f32
    %cst_78 = arith.constant -3.14159274 : f32
    %237 = vector.broadcast %cst_77 : f32 to vector<8x128xf32>
    %238 = vector.broadcast %cst_78 : f32 to vector<8x128xf32>
    %239 = arith.select %236, %237, %238 : vector<8x128xi1>, vector<8x128xf32>
    %cst_79 = arith.constant 0.000000e+00 : f32
    %240 = vector.broadcast %cst_79 : f32 to vector<8x128xf32>
    %241 = arith.select %233, %239, %240 : vector<8x128xi1>, vector<8x128xf32>
    %242 = arith.addf %230, %241 : vector<8x128xf32>
    %cst_80 = arith.constant 0.405284733 : f32
    %243 = vector.broadcast %cst_80 : f32 to vector<8x128xf32>
    %244 = arith.mulf %243, %242 : vector<8x128xf32>
    %245 = arith.mulf %244, %242 : vector<8x128xf32>
    %cst_81 = arith.constant 1.000000e+00 : f32
    %246 = vector.broadcast %cst_81 : f32 to vector<8x128xf32>
    %247 = arith.subf %246, %161 : vector<8x128xf32>
    %248 = arith.addf %247, %245 : vector<8x128xf32>
    %cst_82 = arith.constant 1.000000e-07 : f32
    %249 = vector.broadcast %cst_82 : f32 to vector<8x128xf32>
    %250 = arith.addf %248, %249 : vector<8x128xf32>
    %251 = arith.divf %245, %250 : vector<8x128xf32>
    %cst_83 = arith.constant 1.000000e-07 : f32
    %252 = vector.broadcast %cst_83 : f32 to vector<8x128xf32>
    %253 = arith.addf %175, %252 : vector<8x128xf32>
    %254 = arith.divf %166, %253 : vector<8x128xf32>
    %255 = arith.subf %161, %254 : vector<8x128xf32>
    %256 = arith.mulf %251, %245 : vector<8x128xf32>
    %257 = arith.subf %255, %256 : vector<8x128xf32>
    %cst_84 = arith.constant 0.000000e+00 : f32
    %258 = vector.broadcast %cst_84 : f32 to vector<8x128xf32>
    %259 = arith.select %42, %257, %258 : vector<8x128xi1>, vector<8x128xf32>
    %260 = arith.addf %7, %259 : vector<8x128xf32>
    %261 = arith.subf %13, %25 : vector<8x128xf32>
    %262 = math.absf %261 : vector<8x128xf32>
    %263 = arith.subf %16, %28 : vector<8x128xf32>
    %264 = math.absf %263 : vector<8x128xf32>
    %265 = arith.addf %262, %264 : vector<8x128xf32>
    %266 = arith.subf %19, %31 : vector<8x128xf32>
    %267 = math.absf %266 : vector<8x128xf32>
    %268 = arith.addf %265, %267 : vector<8x128xf32>
    %269 = arith.subf %22, %34 : vector<8x128xf32>
    %270 = math.absf %269 : vector<8x128xf32>
    %271 = arith.addf %268, %270 : vector<8x128xf32>
    %cst_85 = arith.constant 0.000000e+00 : f32
    %272 = vector.broadcast %cst_85 : f32 to vector<8x128xf32>
    %273 = arith.select %42, %271, %272 : vector<8x128xi1>, vector<8x128xf32>
    %274 = arith.addf %8, %273 : vector<8x128xf32>
    %c1_i32 = arith.constant 1 : i32
    %c0_86 = arith.constant 0 : index
    %c0_87 = arith.constant 0 : index
    %c0_88 = arith.constant 0 : index
    %275 = vector.load %arg5[%c0_86, %c0_87, %c0_88] : memref<6x8x128xf32, #tpu.memory_space<vmem>>, vector<1x8x128xf32>
    %276 = vector.shape_cast %275 : vector<1x8x128xf32> to vector<8x128xf32>
    %277 = arith.addf %276, %55 : vector<8x128xf32>
    %c0_89 = arith.constant 0 : index
    %c0_90 = arith.constant 0 : index
    %c0_91 = arith.constant 0 : index
    %278 = vector.load %arg5[%c0_89, %c0_90, %c0_91] : memref<6x8x128xf32, #tpu.memory_space<vmem>>, vector<1x8x128xf32>
    %279 = vector.shape_cast %278 : vector<1x8x128xf32> to vector<8x128xf32>
    %280 = vector.shape_cast %277 : vector<8x128xf32> to vector<1x8x128xf32>
    tpu.vector_store %arg5[%c0_89, %c0_90, %c0_91], %280 {strides = array<i32>} : memref<6x8x128xf32, #tpu.memory_space<vmem>>, vector<1x8x128xf32>,
    %c1_92 = arith.constant 1 : index
    %c0_93 = arith.constant 0 : index
    %c0_94 = arith.constant 0 : index
    %281 = vector.load %arg5[%c1_92, %c0_93, %c0_94] : memref<6x8x128xf32, #tpu.memory_space<vmem>>, vector<1x8x128xf32>
    %282 = vector.shape_cast %281 : vector<1x8x128xf32> to vector<8x128xf32>
    %283 = arith.addf %282, %58 : vector<8x128xf32>
    %c1_95 = arith.constant 1 : index
    %c0_96 = arith.constant 0 : index
    %c0_97 = arith.constant 0 : index
    %284 = vector.load %arg5[%c1_95, %c0_96, %c0_97] : memref<6x8x128xf32, #tpu.memory_space<vmem>>, vector<1x8x128xf32>
    %285 = vector.shape_cast %284 : vector<1x8x128xf32> to vector<8x128xf32>
    %286 = vector.shape_cast %283 : vector<8x128xf32> to vector<1x8x128xf32>
    tpu.vector_store %arg5[%c1_95, %c0_96, %c0_97], %286 {strides = array<i32>} : memref<6x8x128xf32, #tpu.memory_space<vmem>>, vector<1x8x128xf32>,
    %c2_98 = arith.constant 2 : index
    %c0_99 = arith.constant 0 : index
    %c0_100 = arith.constant 0 : index
    %287 = vector.load %arg5[%c2_98, %c0_99, %c0_100] : memref<6x8x128xf32, #tpu.memory_space<vmem>>, vector<1x8x128xf32>
    %288 = vector.shape_cast %287 : vector<1x8x128xf32> to vector<8x128xf32>
    %289 = arith.addf %288, %62 : vector<8x128xf32>
    %c2_101 = arith.constant 2 : index
    %c0_102 = arith.constant 0 : index
    %c0_103 = arith.constant 0 : index
    %290 = vector.load %arg5[%c2_101, %c0_102, %c0_103] : memref<6x8x128xf32, #tpu.memory_space<vmem>>, vector<1x8x128xf32>
    %291 = vector.shape_cast %290 : vector<1x8x128xf32> to vector<8x128xf32>
    %292 = vector.shape_cast %289 : vector<8x128xf32> to vector<1x8x128xf32>
    tpu.vector_store %arg5[%c2_101, %c0_102, %c0_103], %292 {strides = array<i32>} : memref<6x8x128xf32, #tpu.memory_space<vmem>>, vector<1x8x128xf32>,
    %c3_104 = arith.constant 3 : index
    %c0_105 = arith.constant 0 : index
    %c0_106 = arith.constant 0 : index
    %293 = vector.load %arg5[%c3_104, %c0_105, %c0_106] : memref<6x8x128xf32, #tpu.memory_space<vmem>>, vector<1x8x128xf32>
    %294 = vector.shape_cast %293 : vector<1x8x128xf32> to vector<8x128xf32>
    %295 = arith.addf %294, %123 : vector<8x128xf32>
    %c3_107 = arith.constant 3 : index
    %c0_108 = arith.constant 0 : index
    %c0_109 = arith.constant 0 : index
    %296 = vector.load %arg5[%c3_107, %c0_108, %c0_109] : memref<6x8x128xf32, #tpu.memory_space<vmem>>, vector<1x8x128xf32>
    %297 = vector.shape_cast %296 : vector<1x8x128xf32> to vector<8x128xf32>
    %298 = vector.shape_cast %295 : vector<8x128xf32> to vector<1x8x128xf32>
    tpu.vector_store %arg5[%c3_107, %c0_108, %c0_109], %298 {strides = array<i32>} : memref<6x8x128xf32, #tpu.memory_space<vmem>>, vector<1x8x128xf32>,
    %c4_110 = arith.constant 4 : index
    %c0_111 = arith.constant 0 : index
    %c0_112 = arith.constant 0 : index
    %299 = vector.load %arg5[%c4_110, %c0_111, %c0_112] : memref<6x8x128xf32, #tpu.memory_space<vmem>>, vector<1x8x128xf32>
    %300 = vector.shape_cast %299 : vector<1x8x128xf32> to vector<8x128xf32>
    %301 = arith.addf %300, %260 : vector<8x128xf32>
    %c4_113 = arith.constant 4 : index
    %c0_114 = arith.constant 0 : index
    %c0_115 = arith.constant 0 : index
    %302 = vector.load %arg5[%c4_113, %c0_114, %c0_115] : memref<6x8x128xf32, #tpu.memory_space<vmem>>, vector<1x8x128xf32>
    %303 = vector.shape_cast %302 : vector<1x8x128xf32> to vector<8x128xf32>
    %304 = vector.shape_cast %301 : vector<8x128xf32> to vector<1x8x128xf32>
    tpu.vector_store %arg5[%c4_113, %c0_114, %c0_115], %304 {strides = array<i32>} : memref<6x8x128xf32, #tpu.memory_space<vmem>>, vector<1x8x128xf32>,
    %c5_116 = arith.constant 5 : index
    %c0_117 = arith.constant 0 : index
    %c0_118 = arith.constant 0 : index
    %305 = vector.load %arg5[%c5_116, %c0_117, %c0_118] : memref<6x8x128xf32, #tpu.memory_space<vmem>>, vector<1x8x128xf32>
    %306 = vector.shape_cast %305 : vector<1x8x128xf32> to vector<8x128xf32>
    %307 = arith.addf %306, %274 : vector<8x128xf32>
    %c5_119 = arith.constant 5 : index
    %c0_120 = arith.constant 0 : index
    %c0_121 = arith.constant 0 : index
    %308 = vector.load %arg5[%c5_119, %c0_120, %c0_121] : memref<6x8x128xf32, #tpu.memory_space<vmem>>, vector<1x8x128xf32>
    %309 = vector.shape_cast %308 : vector<1x8x128xf32> to vector<8x128xf32>
    %310 = vector.shape_cast %307 : vector<8x128xf32> to vector<1x8x128xf32>
    tpu.vector_store %arg5[%c5_119, %c0_120, %c0_121], %310 {strides = array<i32>} : memref<6x8x128xf32, #tpu.memory_space<vmem>>, vector<1x8x128xf32>,
    %c0_i32_122 = arith.constant 0 : i32
    %311 = arith.cmpi eq, %arg1, %c0_i32_122 : i32
    %312 = arith.extui %311 : i1 to i32
    %c0_i32_123 = arith.constant 0 : i32
    %313 = arith.cmpi ne, %312, %c0_i32_123 : i32
    scf.if %313 {
      %c0_124 = arith.constant 0 : index
      %c0_125 = arith.constant 0 : index
      %c0_126 = arith.constant 0 : index
      %314 = vector.load %arg5[%c0_124, %c0_125, %c0_126] : memref<6x8x128xf32, #tpu.memory_space<vmem>>, vector<6x8x128xf32>
      %315 = vector.shape_cast %314 : vector<6x8x128xf32> to vector<1x6x8x128xf32>
      %c0_127 = arith.constant 0 : index
      %c0_128 = arith.constant 0 : index
      %c0_129 = arith.constant 0 : index
      %c0_130 = arith.constant 0 : index
      %316 = vector.load %arg4[%c0_127, %c0_128, %c0_129, %c0_130] : memref<1x6x8x128xf32, #tpu.memory_space<vmem>>, vector<1x6x8x128xf32>
      tpu.vector_store %arg4[%c0_127, %c0_128, %c0_129, %c0_130], %315 {strides = array<i32>} : memref<1x6x8x128xf32, #tpu.memory_space<vmem>>, vector<1x6x8x128xf32>,
    } else {
    }
    return
  }
  func.func @transform_0(%arg0: i32, %arg1: i32) -> (i32, i32, i32) {
    %c1_i32 = arith.constant 1 : i32
    %0 = arith.muli %arg0, %c1_i32 : i32
    %1 = arith.addi %0, %arg1 : i32
    %c0_i32 = arith.constant 0 : i32
    %c0_i32_0 = arith.constant 0 : i32
    %c0_i32_1 = arith.constant 0 : i32
    return %c0_i32, %1, %c0_i32_0 : i32, i32, i32
  }
  func.func @transform_1(%arg0: i32, %arg1: i32) -> (i32, i32, i32) {
    %c1_i32 = arith.constant 1 : i32
    %0 = arith.muli %arg0, %c1_i32 : i32
    %1 = arith.addi %0, %arg1 : i32
    %c0_i32 = arith.constant 0 : i32
    %c0_i32_0 = arith.constant 0 : i32
    %c0_i32_1 = arith.constant 0 : i32
    return %c0_i32, %1, %c0_i32_0 : i32, i32, i32
  }
  func.func @transform_2(%arg0: i32, %arg1: i32) -> (i32, i32, i32, i32) {
    %c0_i32 = arith.constant 0 : i32
    %c0_i32_0 = arith.constant 0 : i32
    %c0_i32_1 = arith.constant 0 : i32
    %c0_i32_2 = arith.constant 0 : i32
    return %arg0, %c0_i32, %c0_i32_0, %c0_i32_1 : i32, i32, i32, i32
  }
}

</mosaic_0001>

<bundles_post_ra>
// kernel: yolov8_loss.2
= control target key start
LH: loop header
LB: loop body
LE: loop exit
PB: predicated region body
PF: predicated region fallthrough
CT: control target
= control target key end

     0   :  { %s732_s9 = smov 0   ;;  %s734_s10 = smov 0   ;;  %s915_s0 = inlined_call_operand.vmem [shape: f32[1,8,16,128], index: 0, kind: input, shape index: {}]   ;;  %s916_s1 = inlined_call_operand.vmem [shape: f32[1,8,16,128], index: 1, kind: input, shape index: {}]   ;;  %s917_s2 = inlined_call_operand.vmem [shape: f32[2,6,8,128], index: 2, kind: output, shape index: {}]  }
   0x1   :  { %s736_s11 = smov 0  }
   0x2 LB: > { %s24_s12 = sadd.s32 1, %s707_s10  ;;  %p611_p0 = scmp.ge.s32.totalorder %s711_s11, 1  ;;  %s711_s11 = sphi %s736_s11, %s12_s11   ;;  %s707_s10 = sphi %s734_s10, %s921_s10   ;;  %s703_s9 = sphi %s732_s9, %s920_s9  }
   0x3   : > { %p26_p1 = scmp.ge.s32.totalorder %s24_s12, 2  ;;  %p140_p2 = scmp.lt.s32.totalorder %s711_s11, 3 }
   0x5   : > { %s923_s12 = smov (%p26_p1, %s24_s12), 0  ;;  %p141_p3 = pnand %p611_p0, %p140_p2 }
   0x6   : > { %p168_p4 = scmp.lt.s32.totalorder (!%p141_p3), %s703_s9, 1  ;;  %v713_v10 = vmov (!%p141_p3), 0.0   ;;  %vm714_vm3 = vmmov (!%p141_p3), 1  }
   0x7   : > { %144 = sbr.rel (%p141_p3) target bundleno = 127 (0x7f), region = 28 }
   0xe   : > { %s925_s9 = smov (!%p168_p4, %s703_s9), 1 }
   0xf   : > { %s612_s13 = sshll.u32 %s925_s9, 3  ;;  %s634_s17 = smul.u32 48, %s925_s9 }
  0x10   : > { %s753_s16 = scalar_lea.vmem %s916_s1, %s612_s13  ;;  %s765_s20 = scalar_lea.vmem %s915_s0, %s612_s13 }
  0x11   : > { %v756_v0 = vld [vmem:[%s753_s16 + $0x40] sm:$0xff]  ;;  %v759_v1 = vld [vmem:[%s753_s16 + $0x50] sm:$0xff]  ;;  %s774_s23 = scalar_lea.vmem %s917_s2, %s634_s17 }
  0x12   : > { %v296_v2 = vand.u32 2147483647, %v756_v0  ;;  %v768_v3 = vld [vmem:[%s753_s16 + $0x60] sm:$0xff]  ;;  %v317_v4 = vand.u32 2147483647, %v759_v1  ;;  %v780_v7 = vld [vmem:[%s753_s16 + $0x70] sm:$0xff] }
  0x13   : > { %v777_v5 = vld [vmem:[%s765_s20 + $0x40] sm:$0xff]  ;;  %v334_v12 = vand.u32 2147483647, %v768_v3  ;;  %v351_v15 = vand.u32 2147483647, %v780_v7  ;;  %v798_v22 = vld [vmem:[%s753_s16 + $0x10] sm:$0xff] }
  0x14   : > { %v297_v6 = vsub.f32 0.0, %v296_v2  ;;  %vm292_vm0 = vcmp.gt.f32.partialorder %v777_v5, 0.0  ;;  %v318_v8 = vsub.f32 0.0, %v317_v4  ;;  %v790_v16 = vld [vmem:[%s753_s16] sm:$0xff]  ;;  %v801_v23 = vld [vmem:[%s765_s20 + $0x10] sm:$0xff]  ;;  %v293_v48 = vmax.f32 %v756_v0, 0.0 }
  0x15   : > { %v307_v11 = vsel %vm292_vm0, 1.0, %v713_v10  ;;  %v335_v14 = vsub.f32 0.0, %v334_v12  ;;  %v793_v17 = vld [vmem:[%s765_s20] sm:$0xff]  ;;  %v352_v19 = vsub.f32 0.0, %v351_v15  ;;  %v804_v24 = vld [vmem:[%s765_s20 + $0x30] sm:$0xff]  ;;  %v395_v25 = vsub.f32 %v798_v22, %v801_v23 }
  0x16   : > { %v298_v9 = vmul.f32 1.442695, %v297_v6  ;;  %v319_v13 = vmul.f32 1.442695, %v318_v8  ;;  %514 = vst [vmem:[%s774_s23 + $0x10] sm:$0xff] %v307_v11  ;;  %v394_v20 = vsub.f32 %v790_v16, %v793_v17  ;;  %v809_v27 = vld [vmem:[%s753_s16 + $0x30] sm:$0xff]  ;;  %v294_v49 = vmul.f32 %v777_v5, %v756_v0 }
  0x17   : > { %v336_v18 = vmul.f32 1.442695, %v335_v14  ;;  %v353_v21 = vmul.f32 1.442695, %v352_v19  ;;  %v397_v28 = vmul.f32 %v395_v25, %v395_v25  ;;  %v812_v30 = vadd.f32 1e-07, %v804_v24 }
  0x18   : > { %663 = vpow2.f32 %v298_v9  ;;  %v396_v26 = vmul.f32 %v394_v20, %v394_v20  ;;  %v616_v32 = vld [vmem:[%s753_s16 + $0x20] sm:$0xff]  ;;  %v409_v36 = vadd.f32 1e-07, %v809_v27  ;;  %v469_v42 = vand.u32 2147483647, %v394_v20  ;;  %v626_v46 = vld [vmem:[%s765_s20 + $0x50] sm:$0xff] }
  0x19   : > { %665 = vpow2.f32 %v319_v13  ;;  %v816_v33 = vld [vmem:[%s765_s20 + $0x20] sm:$0xff]  ;;  %v470_v45 = vand.u32 2147483647, %v395_v25  ;;  %v475_v53 = vsub.f32 %v809_v27, %v804_v24  ;;  %v314_v54 = vmax.f32 %v759_v1, 0.0  ;;  %v628_v57 = vld [vmem:[%s765_s20 + $0x70] sm:$0xff] }
  0x1a   : > { %667 = vpow2.f32 %v336_v18  ;;  %v818_v35 = vadd.f32 %v397_v28, %v396_v26  ;;  %v822_v38 = vmul.f32 %v409_v36, %v812_v30  ;;  %v414_v40 = vmul.f32 %v816_v33, %v616_v32  ;;  %v627_v52 = vld [vmem:[%s765_s20 + $0x60] sm:$0xff] }
  0x1b   : > { %669 = vpow2.f32 %v353_v21  ;;  %v471_v50 = vadd.f32 %v470_v45, %v469_v42  ;;  %v472_v51 = vsub.f32 %v616_v32, %v816_v33  ;;  %v315_v55 = vmul.f32 %v626_v46, %v759_v1 }
  0x1c   : > { %v826_v44 = vadd.f32 %v414_v40, %v822_v38  ;;  %v476_v58 = vand.u32 2147483647, %v475_v53  ;;  %v295_v59 = vsub.f32 %v293_v48, %v294_v49  ;;  %v331_v60 = vmax.f32 %v768_v3, 0.0 }
  0x1d   : > { %v473_v56 = vand.u32 2147483647, %v472_v51  ;;  %v332_v61 = vmul.f32 %v627_v52, %v768_v3  ;;  %v348_v0 = vmax.f32 %v780_v7, 0.0  ;;  %v411_v2 = vmul.f32 %v816_v33, %v409_v36 }
  0x1e   : > { %v412_v4 = vmul.f32 %v616_v32, %v812_v30  ;;  %v316_v8 = vsub.f32 %v314_v54, %v315_v55  ;;  %v349_v9 = vmul.f32 %v628_v57, %v780_v7  ;;  %v362_v18 = vmul.f32 0.5, %v616_v32 }
  0x1f   : > { %v474_v62 = vadd.f32 %v473_v56, %v471_v50  ;;  %v333_v3 = vsub.f32 %v331_v60, %v332_v61  ;;  %v363_v28 = vmul.f32 0.5, %v809_v27  ;;  %v365_v32 = vmul.f32 0.5, %v804_v24 }
  0x20   : > { %v413_v19 = vsub.f32 %v411_v2, %v412_v4  ;;  %v350_v26 = vsub.f32 %v348_v0, %v349_v9  ;;  %v368_v42 = vadd.f32 %v362_v18, %v790_v16 }
  0x21   : > { %v477_v11 = vadd.f32 %v476_v58, %v474_v62  ;;  %v369_v27 = vadd.f32 %v798_v22, %v363_v28  ;;  %v371_v48 = vsub.f32 %v801_v23, %v365_v32  ;;  %v373_v49 = vadd.f32 %v801_v23, %v365_v32 }
  0x22   : > { %v664_v29 = vpop.eup %663 }
  0x23   : > { %v666_v31 = vpop.eup %665  ;;  %v300_v34 = vadd.f32 1.0, %v664_v29  ;;  %v478_v14 = vsel %vm292_vm0, %v477_v11, 0.0  ;;  %v364_v29 = vmul.f32 0.5, %v816_v33  ;;  %v378_v51 = vmin.f32 %v369_v27, %v373_v49 }
  0x24   : > { %v321_v37 = vadd.f32 1.0, %v666_v31  ;;  %v668_v39 = vpop.eup %667  ;;  %517 = vst [vmem:[%s774_s23 + $0x28] sm:$0xff] %v478_v14  ;;  %v387_v61 = vsub.f32 %v373_v49, %v371_v48 }
  0x25   : > { %671 = vlog2.f32 %v300_v34  ;;  %v338_v41 = vadd.f32 1.0, %v668_v39  ;;  %v670_v43 = vpop.eup %669  ;;  %v372_v45 = vadd.f32 %v364_v29, %v793_v17  ;;  %v370_v24 = vsub.f32 %v793_v17, %v364_v29 }
  0x26   : > { %673 = vlog2.f32 %v321_v37  ;;  %v355_v47 = vadd.f32 1.0, %v670_v43  ;;  %v367_v43 = vsub.f32 %v798_v22, %v363_v28  ;;  %v449_v28 = vmul.f32 %v816_v33, %v812_v30 }
  0x27   : > { %675 = vlog2.f32 %v338_v41  ;;  %v366_v41 = vsub.f32 %v790_v16, %v362_v18  ;;  %v374_v50 = vmin.f32 %v368_v42, %v372_v45  ;;  %v386_v60 = vsub.f32 %v372_v45, %v370_v24 }
  0x28   : > { %677 = vlog2.f32 %v355_v47  ;;  %v379_v52 = vmax.f32 %v367_v43, %v371_v48  ;;  %v384_v56 = vsub.f32 %v369_v27, %v367_v43  ;;  %vm450_vm6 = vcmp.gt.f32.partialorder %v449_v28, 0.0 }
  0x29   : > { %679 = vrcp.f32 %v826_v44  ;;  %v375_v23 = vmax.f32 %v366_v41, %v370_v24  ;;  %v383_v55 = vsub.f32 %v368_v42, %v366_v41  ;;  %v388_v4 = vmul.f32 %v387_v61, %v386_v60 }
  0x2b   : > { %v376_v58 = vsub.f32 %v374_v50, %v375_v23  ;;  %v385_v2 = vmul.f32 %v384_v56, %v383_v55 }
  0x2d   : > { %v389_v9 = vadd.f32 %v388_v4, %v385_v2 }
  0x2f   : > { %v672_v63 = vpop.eup %671 }
  0x30   : > { %v674_v1 = vpop.eup %673  ;;  %v302_v6 = vmul.f32 0.6931472, %v672_v63  ;;  %v377_v63 = vmax.f32 %v376_v58, 0.0 }
  0x31   : > { %v323_v12 = vmul.f32 0.6931472, %v674_v1  ;;  %v676_v15 = vpop.eup %675 }
  0x32   : > { %v303_v13 = vadd.f32 %v302_v6, %v295_v59  ;;  %v340_v25 = vmul.f32 0.6931472, %v676_v15  ;;  %v678_v7 = vpop.eup %677  ;;  %v380_v59 = vsub.f32 %v378_v51, %v379_v52 }
  0x33   : > { %v324_v21 = vadd.f32 %v323_v12, %v316_v8  ;;  %v680_v31 = vpop.eup %679  ;;  %v357_v36 = vmul.f32 0.6931472, %v678_v7 }
  0x34   : > { %v305_v20 = vsel %vm292_vm0, %v303_v13, 0.0  ;;  %512 = vst [vmem:[%s774_s23] sm:$0xff] %v303_v13  ;;  %v341_v34 = vadd.f32 %v340_v25, %v333_v3  ;;  %v856_v37 = vmul.f32 %v680_v31, %v413_v19  ;;  %v381_v0 = vmax.f32 %v380_v59, 0.0 }
  0x35   : > { %513 = vst [vmem:[%s774_s23 + $0x8] sm:$0xff] %v305_v20  ;;  %v358_v40 = vadd.f32 %v357_v36, %v350_v26  ;;  %v399_v19 = vmax.f32 %v368_v42, %v372_v45  ;;  %v400_v20 = vmin.f32 %v366_v41, %v370_v24  ;;  %v403_v25 = vmin.f32 %v367_v43, %v371_v48 }
  0x36   : > { %v342_v39 = vadd.f32 %v341_v34, %v324_v21  ;;  %v864_v46 = vand.u32 2147483647, %v856_v37  ;;  %v382_v8 = vmul.f32 %v381_v0, %v377_v63  ;;  %v402_v21 = vmax.f32 %v369_v27, %v373_v49 }
  0x37   : > { %v401_v29 = vsub.f32 %v399_v19, %v400_v20  ;;  %vm418_vm7 = vcmp.lt.f32.partialorder %v856_v37, 0.0  ;;  %v715_v43 = vmov -3.1415927  }
  0x38   : > { %v359_v47 = vadd.f32 %v358_v40, %v342_v39  ;;  %vm421_vm1 = vcmp.gt.f32.partialorder %v864_v46, 2.4142137  ;;  %vm422_vm2 = vcmp.gt.f32.partialorder %v864_v46, 0.41421357  ;;  %v428_v16 = vadd.f32 1.0, %v864_v46 }
  0x39   : > { %vm423_vm4 = vmxor %vm421_vm1, %vm714_vm3  ;;  %v629_v57 = vadd.f32 -1.0, %v864_v46  ;;  %v390_v13 = vsub.f32 %v389_v9, %v382_v8  ;;  %v404_v31 = vsub.f32 %v402_v21, %v403_v25  ;;  %v447_v39 = vmul.f32 %v826_v44, %v822_v38 }
  0x3a   : > { %v360_v22 = vsel %vm292_vm0, %v359_v47, 0.0  ;;  %vm876_vm5 = vmand %vm422_vm2, %vm423_vm4  ;;  %v405_v40 = vmul.f32 %v401_v29, %v401_v29  ;;  %v451_v27 = vsel %vm450_vm6, 3.1415927, %v715_v43  ;;  %v716_v47 = vmov 1.0  }
  0x3b   : > { %515 = vst [vmem:[%s774_s23 + $0x18] sm:$0xff] %v360_v22  ;;  %v429_v53 = vsel %vm876_vm5, %v428_v16, 1.0  ;;  %v426_v62 = vsel %vm876_vm5, %v629_v57, %v864_v46  ;;  %v391_v15 = vadd.f32 1e-07, %v390_v13  ;;  %v433_v36 = vsel %vm876_vm5, 0.7853982, %v713_v10 }
  0x3c   : > { %v430_v54 = vsel %vm421_vm1, %v864_v46, %v429_v53  ;;  %v427_v1 = vsel %vm421_vm1, -1.0, %v426_v62  ;;  %v406_v41 = vmul.f32 %v404_v31, %v404_v31  ;;  %v434_v30 = vsel %vm421_vm1, 1.5707964, %v433_v36 }
  0x3d   : > { %681 = vrcp.f32 %v430_v54  ;;  %vm448_vm8 = vcmp.lt.f32.partialorder %v447_v39, 0.0  ;;  %v419_v10 = vsel %vm418_vm7, -1.0, %v716_v47 }
  0x3e   : > { %683 = vrcp.f32 %v391_v15  ;;  %v407_v24 = vadd.f32 %v406_v41, %v405_v40  ;;  %v452_v49 = vsel %vm448_vm8, %v451_v27, 0.0 }
  0x40   : > { %v461_v22 = vadd.f32 1e-07, %v407_v24 }
  0x42   : > { %685 = vrcp.f32 %v461_v22 }
  0x47   : > { %v682_v6 = vpop.eup %681 }
  0x48   : > { %v432_v11 = vmul.f32 %v682_v6, %v427_v1  ;;  %v684_v45 = vpop.eup %683 }
  0x49   : > { %v393_v38 = vmul.f32 %v684_v45, %v382_v8 }
  0x4a   : > { %v435_v12 = vmul.f32 %v432_v11, %v432_v11 }
  0x4b   : > { %v456_v50 = vsub.f32 1.0, %v393_v38 }
  0x4c   : > { %v436_v3 = vmul.f32 0.080537446, %v435_v12  ;;  %v686_v51 = vpop.eup %685 }
  0x4d   : > { %v463_v52 = vmul.f32 %v686_v51, %v818_v35 }
  0x4e   : > { %v630_v14 = vadd.f32 -0.13877685, %v436_v3 }
  0x4f   : > { %v464_v55 = vsub.f32 %v393_v38, %v463_v52 }
  0x50   : > { %v438_v18 = vmul.f32 %v630_v14, %v435_v12 }
  0x52   : > { %v439_v26 = vadd.f32 0.19977711, %v438_v18 }
  0x54   : > { %v440_v7 = vmul.f32 %v439_v26, %v435_v12 }
  0x56   : > { %v631_v34 = vadd.f32 -0.3333295, %v440_v7 }
  0x58   : > { %v442_v32 = vmul.f32 %v631_v34, %v435_v12 }
  0x5a   : > { %v443_v42 = vmul.f32 %v442_v32, %v432_v11 }
  0x5c   : > { %v444_v33 = vadd.f32 %v443_v42, %v432_v11 }
  0x5e   : > { %v445_v48 = vadd.f32 %v444_v33, %v434_v30 }
  0x60   : > { %v446_v44 = vmul.f32 %v445_v48, %v419_v10 }
  0x62   : > { %v453_v16 = vadd.f32 %v452_v49, %v446_v44 }
  0x64   : > { %v454_v37 = vmul.f32 0.40528473, %v453_v16 }
  0x66   : > { %v455_v17 = vmul.f32 %v454_v37, %v453_v16 }
  0x68   : > { %v457_v46 = vadd.f32 %v456_v50, %v455_v17 }
  0x6a   : > { %v458_v23 = vadd.f32 1e-07, %v457_v46 }
  0x6c   : > { %687 = vrcp.f32 %v458_v23 }
  0x76   : > { %v688_v53 = vpop.eup %687 }
  0x77   : > { %v460_v54 = vmul.f32 %v688_v53, %v455_v17 }
  0x79   : > { %v465_v56 = vmul.f32 %v460_v54, %v455_v17 }
  0x7b   : > { %v466_v57 = vsub.f32 %v464_v55, %v465_v56 }
  0x7d   : > { %v467_v58 = vsel %vm292_vm0, %v466_v57, 0.0 }
  0x7e   : > { %516 = vst [vmem:[%s774_s23 + $0x20] sm:$0xff] %v467_v58 }
  0x7f PF: > { %s12_s11 = sadd.s32 1, %s711_s11   ;;  %s920_s9 = smov %s707_s10 }
  0x80   : > { %p9_p5 = scmp.ge.s32.totalorder %s12_s11, 4   ;;  %s921_s10 = smov %s923_s12 }
  0x82   :  { %11 = sbr.rel (!%p9_p5) target bundleno = 2 (0x2), region = 116 }

</bundles_post_ra>
